<compile_context>
chip_gen: v6e
topology: v6e:2x2x1
jax: 0.10.0
libtpu: 0.0.40
codegen_flags: <defaults>
</compile_context>

<pallas_src>
import numpy as np
import jax
import jax.numpy as jnp
from jax import lax
from jax.experimental import pallas as pl
from jax.experimental.pallas import tpu as pltpu


# --------------------------------------------------------------------------- #
# Kernel
# --------------------------------------------------------------------------- #

def _make_kernel(n_rows, c, row_tile, sub_rows, n_sub, t_steps, alpha, crop):
    """CE partial sums (+ shifted-CAM MSE) over grid (P_parallel, T_arbitrary).

    crop: None, or (h1, w1c, h2, w2c, h_len, w_lenc) static ints on the
    flattened (B, 8, 8*CH) CAM layout.
    """

    def kernel(*refs):
        if crop is not None:
            tgt_ref, logits_ref, cam1_ref, cam2_ref, out_ref, acc_ref = refs
        else:
            tgt_ref, logits_ref, out_ref, acc_ref = refs
            cam1_ref = cam2_ref = None

        p = pl.program_id(0)
        t = pl.program_id(1)

        @pl.when(t == 0)
        def _init():
            acc_ref[...] = jnp.zeros_like(acc_ref)

        # Global row of this block's first row.  Uses the UNCLAMPED linear
        # block index so overflow blocks (p*T + t >= nblk) mask out entirely.
        row0 = (p * t_steps + t) * row_tile

        # Loop-invariant iotas, hoisted out of the chunk loop.
        col = lax.broadcasted_iota(jnp.int32, (sub_rows, c), 1)
        sub_iota = lax.broadcasted_iota(jnp.int32, (sub_rows, 1), 0)

        def chunk(s, carry):
            off = pl.multiple_of(s * sub_rows, 8)
            logits = logits_ref[pl.ds(off, sub_rows), :].astype(jnp.float32)
            tgt = tgt_ref[pl.ds(off, sub_rows), :]                  # (SR,1) i32
            # target logit via iota mask (no one-hot, no 0*inf edge case)
            tgt_logit = jnp.sum(
                jnp.where(col == tgt, logits, jnp.float32(0.0)),
                axis=-1, keepdims=True)                             # (SR,1)
            m = jnp.max(logits, axis=-1, keepdims=True)
            lse = jnp.log(jnp.sum(jnp.exp(logits - m),
                                  axis=-1, keepdims=True)) + m      # (SR,1)
            grow = row0 + off + sub_iota                            # global row
            per_row = jnp.where(grow < n_rows, lse - tgt_logit,
                                jnp.float32(0.0))
            return carry + jnp.sum(per_row)

        # TODO(synk): for very large class counts (sub_rows*C f32 temporaries
        # > ~8 MiB even at 8 rows) add a class-chunked online-logsumexp grid
        # axis; current tiling only shrinks the row dimension.
        tile_sum = lax.fori_loop(0, n_sub, chunk, jnp.float32(0.0),
                                 unroll=(n_sub <= 8))
        acc_ref[...] = acc_ref[...] + tile_sum

        @pl.when(t == t_steps - 1)
        def _finalize():
            sub = lax.broadcasted_iota(jnp.int32, (8, 128), 0)
            lane = lax.broadcasted_iota(jnp.int32, (8, 128), 1)
            ce_sum = acc_ref[...][0, 0]
            vec = jnp.where((sub == 0) & (lane == 0), ce_sum, jnp.float32(0.0))
            if crop is not None:
                h1, w1c, h2, w2c, h_len, w_lenc = crop
                a = cam1_ref[:, pl.ds(h1, h_len), pl.ds(w1c, w_lenc)]
                b = cam2_ref[:, pl.ds(h2, h_len), pl.ds(w2c, w_lenc)]
                d = a.astype(jnp.float32) - b.astype(jnp.float32)
                mse = jnp.sum(d * d) * jnp.float32(1.0 / d.size)
                mse = jnp.where(p == 0, jnp.float32(alpha) * mse,
                                jnp.float32(0.0))
                vec = jnp.where((sub == 0) & (lane == 1), mse, vec)
            out_ref[...] = vec

    return kernel


# --------------------------------------------------------------------------- #
# Host-side helpers
# --------------------------------------------------------------------------- #

_TEMP_BUDGET = 2 << 20   # bytes of live f32 temporaries per compute chunk
_K_TEMPS = 8             # ~number of (sub_rows, C) f32-sized live temporaries
_DMA_BUDGET = 12 << 20   # double-buffered logits + lane-padded target blocks


def _tiling(n, c, itemsize):
    """Return (row_tile, sub_rows, n_sub), row_tile = sub_rows * n_sub."""
    sub_rows = max(8, (_TEMP_BUDGET // (_K_TEMPS * 4 * c)) // 8 * 8)
    if n <= sub_rows:
        return n, n, 1
    # per-row VMEM cost: 2x-buffered logits + 2x-buffered lane-padded target
    row_bytes = 2 * c * itemsize + 2 * 128 * 4
    n_sub = max(1, _DMA_BUDGET // (row_bytes * sub_rows))
    n_sub = min(n_sub, -(-n // sub_rows))
    return sub_rows * n_sub, sub_rows, n_sub


def _crop_params(cam1, pos_index):
    """Mirror the PyTorch pos_index -> shifted-crop logic (host-side)."""
    # TODO(synk): pos_index must be host data (int / numpy / concrete array);
    # a traced value cannot drive this Python branch, same as in PyTorch.
    pos = np.asarray(pos_index).reshape(-1)
    if pos.size == 0 or len(np.unique(pos)) != 1:
        return None
    pv = int(pos[0])
    i = pv % 3 - 1
    j = pv // 3 - 1
    h_len = 8 - 4 * abs(i)
    w_len = 8 - 4 * abs(j)
    h1, w1 = max(0, -4 * i), max(0, -4 * j)
    h2, w2 = max(0, 4 * i), max(0, 4 * j)
    ch = cam1.shape[-1]
    # offsets / lengths on the flattened (B, 8, 8*CH) CAM layout
    return (h1, w1 * ch, h2, w2 * ch, h_len, w_len * ch)


def rcam_loss(output, target, cam1=None, cam2=None, pos_index=0,
              alpha_RCAM=1.0, tile_override=None):
    """Pallas TPU forward of RCAMLoss (weight=None, reduction='mean')."""
    n, c = output.shape
    itemsize = int(np.dtype(output.dtype).itemsize)

    crop = None
    cams = ()
    cam_shape = None
    if cam1 is not None:
        crop = _crop_params(cam1, pos_index)
        if crop is not None:
            cb, chh, cww, cch = cam1.shape            # (B, 8, 8, CH) NHWC
            cam_shape = (cb, chh, cww * cch)          # lane-dense crop layout
            cams = (cam1.reshape(cam_shape), cam2.reshape(cam_shape))

    if tile_override is not None:
        row_tile, sub_rows, n_sub = tile_override
    else:
        row_tile, sub_rows, n_sub = _tiling(n, c, itemsize)
    assert row_tile == sub_rows * n_sub

    nblk = pl.cdiv(n, row_tile)
    num_par = 2 if nblk >= 2 else 1      # feeds v7x's 2nd TensorCore
    t_steps = pl.cdiv(nblk, num_par)

    def row_block(p, t):
        return jnp.minimum(p * t_steps + t, nblk - 1)

    in_specs = [
        pl.BlockSpec((row_tile, 1), lambda p, t: (row_block(p, t), 0)),
        pl.BlockSpec((row_tile, c), lambda p, t: (row_block(p, t), 0)),
    ]
    if crop is not None:
        in_specs += [
            pl.BlockSpec(cam_shape, lambda p, t: (0, 0, 0)),
            pl.BlockSpec(cam_shape, lambda p, t: (0, 0, 0)),
        ]

    kernel = _make_kernel(n, c, row_tile, sub_rows, n_sub, t_steps,
                          float(alpha_RCAM), crop)

    cam_vmem = 0
    cam_hbm = 0
    if crop is not None:
        cam_elems = int(np.prod(cam_shape))
        cam_item = int(np.dtype(cam1.dtype).itemsize)
        cam_vmem = 2 * 2 * cam_elems * cam_item       # 2 arrays, 2 buffers
        cam_hbm = 2 * cam_elems * cam_item
    vmem_est = (2 * row_tile * (c * itemsize + 512)   # logits + padded target
                + _K_TEMPS * 4 * sub_rows * c         # compute temporaries
                + cam_vmem + 2 * 8 * 128 * 4)
    vmem_limit = int(min(max(2 * vmem_est, 32 << 20), 48 << 20))

    cost = pl.CostEstimate(
        flops=6 * n * c,
        transcendentals=n * (c + 1),
        bytes_accessed=n * c * itemsize + n * 4 + cam_hbm
                       + num_par * 8 * 128 * 4)

    tgt2d = target.astype(jnp.int32).reshape(n, 1)

    out = pl.pallas_call(
        kernel,
        grid=(num_par, t_steps),
        out_shape=jax.ShapeDtypeStruct((num_par * 8, 128), jnp.float32),
        in_specs=in_specs,
        out_specs=pl.BlockSpec((8, 128), lambda p, t: (p, 0)),
        scratch_shapes=[pltpu.VMEM((1, 1), jnp.float32)],
        compiler_params=pltpu.CompilerParams(
            dimension_semantics=("parallel", "arbitrary"),
            vmem_limit_bytes=vmem_limit),
        cost_estimate=cost,
    )(tgt2d, output, *cams)

    # tiny per-superblock combine (only lanes 0/1 of row p*8 are nonzero)
    loss = jnp.sum(out[:, 0]) / jnp.float32(n)
    if crop is not None:
        loss = loss + jnp.sum(out[:, 1])              # alpha already applied
    return loss


# --------------------------------------------------------------------------- #
# Main
# --------------------------------------------------------------------------- #

if __name__ == "__main__":
    key = jax.random.PRNGKey(0)
    k1, k2, k3, k4, k5, k6 = jax.random.split(key, 6)

    # Small shapes consistent with the module (CAM spatial is fixed at 8x8).
    N, C = 8, 16          # CE batch, classes
    B, CH = 2, 4          # CAM batch, CAM channels

    output = jax.random.normal(k1, (N, C), dtype=jnp.float32)
    target = jax.random.randint(k2, (N,), 0, C, dtype=jnp.int32)
    cam1 = jax.random.normal(k3, (B, 8, 8, CH), dtype=jnp.float32)
    cam2 = jax.random.normal(k4, (B, 8, 8, CH), dtype=jnp.float32)
    pos_index = np.array([5, 5], dtype=np.int32)   # unique -> i=1, j=0 shift

    def ce_ref(logits, tgt):
        lse = jax.nn.logsumexp(logits.astype(jnp.float32), axis=-1)
        picked = jnp.take_along_axis(
            logits.astype(jnp.float32), tgt[:, None], axis=-1)[:, 0]
        return jnp.mean(lse - picked)

    # full path: CE + shifted-CAM MSE
    loss = jax.block_until_ready(
        rcam_loss(output, target, cam1, cam2, pos_index, alpha_RCAM=1.0))
    ref = ce_ref(output, target) + jnp.mean(
        jnp.square(cam1[:, 0:4, 0:8, :] - cam2[:, 4:8, 0:8, :]))
    assert np.allclose(np.asarray(loss), np.asarray(ref), rtol=1e-5, atol=1e-5)

    # cam1 is None -> loss2 = 0
    loss_ce = jax.block_until_ready(rcam_loss(output, target))
    assert np.allclose(np.asarray(loss_ce), np.asarray(ce_ref(output, target)),
                       rtol=1e-5, atol=1e-5)

    # non-unique pos_index -> loss2 = 0
    loss_nu = jax.block_until_ready(
        rcam_loss(output, target, cam1, cam2, np.array([1, 2]), 2.0))
    assert np.allclose(np.asarray(loss_nu), np.asarray(ce_ref(output, target)),
                       rtol=1e-5, atol=1e-5)

    # Exercise multi-block / 2-superblock / ragged-last-tile / chunked-row
    # paths with small data by overriding the tile sizes.
    N2, C2 = 100, 16
    out2 = jax.random.normal(k5, (N2, C2), dtype=jnp.float32)
    tgt2 = jax.random.randint(k6, (N2,), 0, C2, dtype=jnp.int32)
    loss2 = jax.block_until_ready(
        rcam_loss(out2, tgt2, tile_override=(24, 8, 3)))
    assert np.allclose(np.asarray(loss2), np.asarray(ce_ref(out2, tgt2)),
                       rtol=1e-4, atol=1e-4)

    print("KERNEL_OK")
</pallas_src>

<mosaic_0001>
module attributes {stable_mosaic.version = 11 : i64} {
  func.func @kernel(%arg0: i32, %arg1: i32, %arg2: memref<8x1xi32, #tpu.memory_space<vmem>>, %arg3: memref<8x16xf32, #tpu.memory_space<vmem>>, %arg4: memref<2x8x32xf32, #tpu.memory_space<vmem>>, %arg5: memref<2x8x32xf32, #tpu.memory_space<vmem>>, %arg6: memref<8x128xf32, #tpu.memory_space<vmem>>, %arg7: memref<1x1xf32, #tpu.memory_space<vmem>>) attributes {dimension_semantics = [#tpu.dimension_semantics<parallel>, #tpu.dimension_semantics<arbitrary>], iteration_bounds = array<i64: 1, 1>, scalar_prefetch = 0 : i64, scratch_operands = 1 : i64, tpu.core_type = #tpu.core_type<tc>, window_params = [{transform_indices = @transform_0, window_bounds = array<i64: 8, 1>}, {transform_indices = @transform_1, window_bounds = array<i64: 8, 16>}, {pipeline_mode = #tpu.pipeline_mode<synchronous>, transform_indices = @transform_2, window_bounds = array<i64: 2, 8, 32>}, {pipeline_mode = #tpu.pipeline_mode<synchronous>, transform_indices = @transform_3, window_bounds = array<i64: 2, 8, 32>}, {transform_indices = @transform_4, window_bounds = array<i64: 8, 128>}]} {
    %c0_i32 = arith.constant 0 : i32
    %0 = arith.cmpi eq, %arg1, %c0_i32 : i32
    %1 = arith.extui %0 : i1 to i32
    %c0_i32_0 = arith.constant 0 : i32
    %2 = arith.cmpi ne, %1, %c0_i32_0 : i32
    scf.if %2 {
      %cst_18 = arith.constant 0.000000e+00 : f32
      %49 = vector.broadcast %cst_18 : f32 to vector<1x1xf32>
      %c0_19 = arith.constant 0 : index
      %c0_20 = arith.constant 0 : index
      %50 = vector.load %arg7[%c0_19, %c0_20] : memref<1x1xf32, #tpu.memory_space<vmem>>, vector<1x1xf32>
      tpu.vector_store %arg7[%c0_19, %c0_20], %49 {strides = array<i32>} : memref<1x1xf32, #tpu.memory_space<vmem>>, vector<1x1xf32>,
    } else {
    }
    %c1_i32 = arith.constant 1 : i32
    %3 = arith.muli %arg0, %c1_i32 : i32
    %4 = arith.addi %3, %arg1 : i32
    %c8_i32 = arith.constant 8 : i32
    %5 = arith.muli %4, %c8_i32 : i32
    %6 = tpu.iota {dimensions = array<i32: 1>} : vector<8x16xi32>
    %7 = tpu.iota {dimensions = array<i32: 0>} : vector<8x1xi32>
    %cst = arith.constant 0.000000e+00 : f32
    %c0_i32_1 = arith.constant 0 : i32
    %c8_i32_2 = arith.constant 8 : i32
    %8 = arith.muli %c0_i32_1, %c8_i32_2 : i32
    %9 = tpu.assume_multiple %8, 8 : i32
    %10 = arith.index_cast %9 : i32 to index
    %c0 = arith.constant 0 : index
    %11 = vector.load %arg3[%10, %c0] : memref<8x16xf32, #tpu.memory_space<vmem>>, vector<8x16xf32>
    %12 = arith.index_cast %9 : i32 to index
    %c0_3 = arith.constant 0 : index
    %13 = vector.load %arg2[%12, %c0_3] : memref<8x1xi32, #tpu.memory_space<vmem>>, vector<8x1xi32>
    %14 = vector.broadcast %13 : vector<8x1xi32> to vector<8x16xi32>
    %15 = arith.cmpi eq, %6, %14 : vector<8x16xi32>
    %cst_4 = arith.constant 0.000000e+00 : f32
    %16 = vector.broadcast %cst_4 : f32 to vector<8x16xf32>
    %17 = arith.select %15, %11, %16 : vector<8x16xi1>, vector<8x16xf32>
    %cst_5 = arith.constant dense<0.000000e+00> : vector<8xf32>
    %18 = vector.multi_reduction <add>, %17, %cst_5 [1] : vector<8x16xf32> to vector<8xf32>
    %19 = vector.shape_cast %18 : vector<8xf32> to vector<8x1xf32>
    %cst_6 = arith.constant dense<0xFF800000> : vector<8xf32>
    %20 = vector.multi_reduction <maximumf>, %11, %cst_6 [1] : vector<8x16xf32> to vector<8xf32>
    %21 = vector.shape_cast %20 : vector<8xf32> to vector<8x1xf32>
    %22 = vector.broadcast %21 : vector<8x1xf32> to vector<8x16xf32>
    %23 = arith.subf %11, %22 : vector<8x16xf32>
    %24 = math.exp %23 : vector<8x16xf32>
    %cst_7 = arith.constant dense<0.000000e+00> : vector<8xf32>
    %25 = vector.multi_reduction <add>, %24, %cst_7 [1] : vector<8x16xf32> to vector<8xf32>
    %26 = vector.shape_cast %25 : vector<8xf32> to vector<8x1xf32>
    %27 = math.log %26 : vector<8x1xf32>
    %28 = arith.addf %27, %21 : vector<8x1xf32>
    %29 = arith.addi %5, %9 : i32
    %30 = vector.broadcast %29 : i32 to vector<8x1xi32>
    %31 = arith.addi %30, %7 : vector<8x1xi32>
    %c8_i32_8 = arith.constant 8 : i32
    %32 = vector.broadcast %c8_i32_8 : i32 to vector<8x1xi32>
    %33 = arith.cmpi slt, %31, %32 : vector<8x1xi32>
    %34 = arith.subf %28, %19 : vector<8x1xf32>
    %cst_9 = arith.constant 0.000000e+00 : f32
    %35 = vector.broadcast %cst_9 : f32 to vector<8x1xf32>
    %36 = arith.select %33, %34, %35 : vector<8x1xi1>, vector<8x1xf32>
    %37 = vector.shape_cast %36 : vector<8x1xf32> to vector<1x8x1xf32>
    %cst_10 = arith.constant dense<0.000000e+00> : vector<1xf32>
    %38 = vector.multi_reduction <add>, %37, %cst_10 [1, 2] : vector<1x8x1xf32> to vector<1xf32>
    %39 = vector.shape_cast %38 : vector<1xf32> to vector<1x1x1xf32>
    %40 = vector.extract %39[0, 0, 0] : f32 from vector<1x1x1xf32>
    %41 = arith.addf %cst, %40 : f32
    %c1_i32_11 = arith.constant 1 : i32
    %c0_12 = arith.constant 0 : index
    %c0_13 = arith.constant 0 : index
    %42 = vector.load %arg7[%c0_12, %c0_13] : memref<1x1xf32, #tpu.memory_space<vmem>>, vector<1x1xf32>
    %43 = vector.broadcast %41 : f32 to vector<1x1xf32>
    %44 = arith.addf %42, %43 : vector<1x1xf32>
    %c0_14 = arith.constant 0 : index
    %c0_15 = arith.constant 0 : index
    %45 = vector.load %arg7[%c0_14, %c0_15] : memref<1x1xf32, #tpu.memory_space<vmem>>, vector<1x1xf32>
    tpu.vector_store %arg7[%c0_14, %c0_15], %44 {strides = array<i32>} : memref<1x1xf32, #tpu.memory_space<vmem>>, vector<1x1xf32>,
    %c0_i32_16 = arith.constant 0 : i32
    %46 = arith.cmpi eq, %arg1, %c0_i32_16 : i32
    %47 = arith.extui %46 : i1 to i32
    %c0_i32_17 = arith.constant 0 : i32
    %48 = arith.cmpi ne, %47, %c0_i32_17 : i32
    scf.if %48 {
      %49 = tpu.iota {dimensions = array<i32: 0>} : vector<8x128xi32>
      %50 = tpu.iota {dimensions = array<i32: 1>} : vector<8x128xi32>
      %c0_18 = arith.constant 0 : index
      %c0_19 = arith.constant 0 : index
      %51 = vector.load %arg7[%c0_18, %c0_19] : memref<1x1xf32, #tpu.memory_space<vmem>>, vector<1x1xf32>
      %52 = vector.extract %51[0, 0] : f32 from vector<1x1xf32>
      %c0_i32_20 = arith.constant 0 : i32
      %53 = vector.broadcast %c0_i32_20 : i32 to vector<8x128xi32>
      %54 = arith.cmpi eq, %49, %53 : vector<8x128xi32>
      %c0_i32_21 = arith.constant 0 : i32
      %55 = vector.broadcast %c0_i32_21 : i32 to vector<8x128xi32>
      %56 = arith.cmpi eq, %50, %55 : vector<8x128xi32>
      %57 = arith.andi %54, %56 : vector<8x128xi1>
      %cst_22 = arith.constant 0.000000e+00 : f32
      %58 = vector.broadcast %52 : f32 to vector<8x128xf32>
      %59 = vector.broadcast %cst_22 : f32 to vector<8x128xf32>
      %60 = arith.select %57, %58, %59 : vector<8x128xi1>, vector<8x128xf32>
      %c0_23 = arith.constant 0 : index
      %c0_24 = arith.constant 0 : index
      %c0_25 = arith.constant 0 : index
      %61 = vector.load %arg4[%c0_23, %c0_24, %c0_25] : memref<2x8x32xf32, #tpu.memory_space<vmem>>, vector<2x4x32xf32>
      %c0_26 = arith.constant 0 : index
      %c4 = arith.constant 4 : index
      %c0_27 = arith.constant 0 : index
      %62 = vector.load %arg5[%c0_26, %c4, %c0_27] : memref<2x8x32xf32, #tpu.memory_space<vmem>>, vector<2x4x32xf32>
      %63 = arith.subf %61, %62 : vector<2x4x32xf32>
      %64 = arith.mulf %63, %63 : vector<2x4x32xf32>
      %65 = vector.shape_cast %64 : vector<2x4x32xf32> to vector<1x2x4x32xf32>
      %cst_28 = arith.constant dense<0.000000e+00> : vector<1xf32>
      %66 = vector.multi_reduction <add>, %65, %cst_28 [1, 2, 3] : vector<1x2x4x32xf32> to vector<1xf32>
      %67 = vector.shape_cast %66 : vector<1xf32> to vector<1x1x1x1xf32>
      %68 = vector.extract %67[0, 0, 0, 0] : f32 from vector<1x1x1x1xf32>
      %cst_29 = arith.constant 3.906250e-03 : f32
      %69 = arith.mulf %68, %cst_29 : f32
      %c0_i32_30 = arith.constant 0 : i32
      %70 = arith.cmpi eq, %arg0, %c0_i32_30 : i32
      %cst_31 = arith.constant 1.000000e+00 : f32
      %71 = arith.mulf %cst_31, %69 : f32
      %cst_32 = arith.constant 0.000000e+00 : f32
      %72 = arith.select %70, %71, %cst_32 : f32
      %c0_i32_33 = arith.constant 0 : i32
      %73 = vector.broadcast %c0_i32_33 : i32 to vector<8x128xi32>
      %74 = arith.cmpi eq, %49, %73 : vector<8x128xi32>
      %c1_i32_34 = arith.constant 1 : i32
      %75 = vector.broadcast %c1_i32_34 : i32 to vector<8x128xi32>
      %76 = arith.cmpi eq, %50, %75 : vector<8x128xi32>
      %77 = arith.andi %74, %76 : vector<8x128xi1>
      %78 = vector.broadcast %72 : f32 to vector<8x128xf32>
      %79 = arith.select %77, %78, %60 : vector<8x128xi1>, vector<8x128xf32>
      %c0_35 = arith.constant 0 : index
      %c0_36 = arith.constant 0 : index
      %80 = vector.load %arg6[%c0_35, %c0_36] : memref<8x128xf32, #tpu.memory_space<vmem>>, vector<8x128xf32>
      tpu.vector_store %arg6[%c0_35, %c0_36], %79 {strides = array<i32>} : memref<8x128xf32, #tpu.memory_space<vmem>>, vector<8x128xf32>,
    } else {
    }
    return
  }
  func.func @transform_0(%arg0: i32, %arg1: i32) -> (i32, i32) {
    %c1_i32 = arith.constant 1 : i32
    %0 = arith.muli %arg0, %c1_i32 : i32
    %1 = arith.addi %0, %arg1 : i32
    %c0_i32 = arith.constant 0 : i32
    %2 = arith.minsi %1, %c0_i32 : i32
    %c0_i32_0 = arith.constant 0 : i32
    %c0_i32_1 = arith.constant 0 : i32
    return %2, %c0_i32_0 : i32, i32
  }
  func.func @transform_1(%arg0: i32, %arg1: i32) -> (i32, i32) {
    %c1_i32 = arith.constant 1 : i32
    %0 = arith.muli %arg0, %c1_i32 : i32
    %1 = arith.addi %0, %arg1 : i32
    %c0_i32 = arith.constant 0 : i32
    %2 = arith.minsi %1, %c0_i32 : i32
    %c0_i32_0 = arith.constant 0 : i32
    %c0_i32_1 = arith.constant 0 : i32
    return %2, %c0_i32_0 : i32, i32
  }
  func.func @transform_2(%arg0: i32, %arg1: i32) -> (i32, i32, i32) {
    %c0_i32 = arith.constant 0 : i32
    %c0_i32_0 = arith.constant 0 : i32
    %c0_i32_1 = arith.constant 0 : i32
    %c0_i32_2 = arith.constant 0 : i32
    return %c0_i32, %c0_i32_0, %c0_i32_1 : i32, i32, i32
  }
  func.func @transform_3(%arg0: i32, %arg1: i32) -> (i32, i32, i32) {
    %c0_i32 = arith.constant 0 : i32
    %c0_i32_0 = arith.constant 0 : i32
    %c0_i32_1 = arith.constant 0 : i32
    %c0_i32_2 = arith.constant 0 : i32
    return %c0_i32, %c0_i32_0, %c0_i32_1 : i32, i32, i32
  }
  func.func @transform_4(%arg0: i32, %arg1: i32) -> (i32, i32) {
    %c0_i32 = arith.constant 0 : i32
    %c0_i32_0 = arith.constant 0 : i32
    return %arg0, %c0_i32 : i32, i32
  }
}

</mosaic_0001>

<bundles_post_ra>
// kernel: tpu_custom_call.1
= control target key start
LH: loop header
LB: loop body
LE: loop exit
PB: predicated region body
PF: predicated region fallthrough
CT: control target
= control target key end

     0   :  { %9 = vsyncpa [#allocation4], 0  ;;  %s366_s0 = inlined_call_operand.vmem [shape: s32[8,1], index: 0, kind: input, shape index: {}]   ;;  %s367_s1 = inlined_call_operand.vmem [shape: f32[8,16], index: 1, kind: input, shape index: {}]   ;;  %s368_s2 = inlined_call_operand.hbm [shape: f32[2,8,32], index: 2, kind: input, shape index: {}]   ;;  %s369_s3 = inlined_call_operand.hbm [shape: f32[2,8,32], index: 3, kind: input, shape index: {}]   ;;  %s370_s4 = inlined_call_operand.hbm [shape: f32[8,128], index: 4, kind: output, shape index: {}]  }
   0x1   :  { %10 = vsyncpa [#allocation7], 0 }
   0x2   :  { %11 = vsyncpa [#allocation5], 0  ;;  %s309_s15 = smov [#allocation3]  }
   0x3   :  { %s41_s16 = sshll.u32 %s309_s15, 4  ;;  %s42_s16 = int_to_ptr.vmem [resolvable:$true] %s41_s16 }
   0x4   :  { %s251_s17 = scalar_lea.vmem %s42_s16, 256  ;;  %p256_p1 = scmp.lt.s32.totalorder %s42_s16, %s42_s16 }
   0x5   :  { %p252_p0 = scmp.ne.s32.totalorder %s42_s16, %s251_s17  ;;  %p257_p2 = scmp.lt.s32.totalorder %s251_s17, %s251_s17 }
   0x7   :  { %p258_p3 = por %p257_p2, %p256_p1 }
   0x9   :  { %p259_p4 = pnand %p258_p3, %p252_p0 }
   0xb   :  { %262 = shalt.err (!%p259_p4)
}
   0xc   :  { %s310_s18 = smov 128   ;;  %s311_s19 = smov 8  }
   0xd   :  { %47 = dma.hbm_to_vmem [thread:$0]  %s368_s2, 256, %s42_s16, [#allocation4], %s310_s18, %s310_s18, %s311_s19  }
   0xe   :  { %s312_s22 = smov [#allocation6]  }
   0xf   :  { %s53_s23 = sshll.u32 %s312_s22, 4  ;;  %s54_s23 = int_to_ptr.vmem [resolvable:$true] %s53_s23 }
  0x10   :  { %s271_s24 = scalar_lea.vmem %s54_s23, 256  ;;  %p276_p6 = scmp.lt.s32.totalorder %s54_s23, %s54_s23 }
  0x11   :  { %p272_p5 = scmp.ne.s32.totalorder %s54_s23, %s271_s24  ;;  %p277_p7 = scmp.lt.s32.totalorder %s271_s24, %s271_s24 }
  0x13   :  { %p278_p8 = por %p277_p7, %p276_p6 }
  0x15   :  { %p279_p9 = pnand %p278_p8, %p272_p5 }
  0x17   :  { %282 = shalt.err (!%p279_p9)
}
  0x18   :  { %59 = dma.hbm_to_vmem [thread:$0]  %s369_s3, 256, %s54_s23, [#allocation7], %s310_s18, %s310_s18, %s311_s19  }
  0x19   :  { %303 = dma.done.wait [#allocation4], 256  }
  0x1a   :  { %304 = vsyncadd [#allocation4], 4294967040 }
  0x1b   :  { %305 = dma.done.wait [#allocation7], 256  }
  0x1c   :  { %306 = vsyncadd [#allocation7], 4294967040  ;;  %v313_v0 = vmov 0   ;;  %vm119_vm0 = vcmask 130048   ;;  %v112_v1 = vld [vmem:[%s367_s1] sm:$0xff]  ;;  %v108_v7 = vlaneseq  ;;  %vm176_vm2 = vcmask 257024  }
  0x1d   :  { %238 = vset.pattern.permute.xlu0 %v313_v0  ;;  %v123_v2 = vsel %vm119_vm0, %v112_v1, -inf  ;;  %v113_v3 = vld [vmem:[%s366_s0] sm:$0xff]  ;;  %v169_v16 = vld [vmem:[#allocation3 + $0x8] sm:$0xf]  ;;  %v170_v17 = vld [vmem:[#allocation6 + $0x4] sm:$0xf] }
  0x1e   :  { %124 = vmax.xlane.f32.xlu0 %v123_v2  ;;  %v354_v8 = vand.u32 127, %v108_v7  ;;  %v168_v15 = vld [vmem:[#allocation3] sm:$0xf]  ;;  %v171_v18 = vld [vmem:[#allocation6 + $0xc] sm:$0xf]  ;;  %vm141_vm3 = vcmask 7168  }
  0x1f   :  { %v172_v19 = vsub.f32 %v168_v15, %v170_v17  ;;  %v173_v20 = vsub.f32 %v169_v16, %v171_v18  ;;  %vm104_vm4 = vcmask 0   ;;  %v314_v32 = vmov 0.0   ;;  %s315_s30 = smov [#allocation8]  }
  0x20   :  { %105 = vst.msk [vmem:[#allocation2] sm:$0x1] %vm104_vm4, %v314_v32  ;;  %v111_v51 = vshrl.u32 %v108_v7, 7  ;;  %vm164_vm6 = vcmp.eq.s32.totalorder %v354_v8, 0  ;;  %vm192_vm8 = vcmp.eq.s32.totalorder %v354_v8, 1  ;;  %s203_s5 = sshll.u32 %s315_s30, 4  ;;  %s204_s5 = int_to_ptr.vmem [resolvable:$true] %s203_s5 }
  0x21   :  { %v174_v23 = vmul.f32 %v172_v19, %v172_v19  ;;  %v175_v24 = vmul.f32 %v173_v20, %v173_v20  ;;  %s283_s7 = scalar_lea.vmem %s204_s5, 128  ;;  %p288_p11 = scmp.lt.s32.totalorder %s204_s5, %s204_s5 }
  0x22   :  { %vm163_vm5 = vcmp.eq.s32.totalorder %v111_v51, 0  ;;  %p284_p10 = scmp.ne.s32.totalorder %s204_s5, %s283_s7  ;;  %p289_p12 = scmp.lt.s32.totalorder %s283_s7, %s283_s7 }
  0x23   :  { %v177_v28 = vsel %vm176_vm2, %v174_v23, 0.0  ;;  %v178_v29 = vsel %vm176_vm2, %v175_v24, 0.0  ;;  %vm165_vm7 = vmand %vm163_vm5, %vm164_vm6 }
  0x24   :  { %v179_v31 = vadd.f32 %v178_v29, %v177_v28  ;;  %vm193_vm9 = vmand %vm163_vm5, %vm192_vm8  ;;  %p290_p13 = por %p289_p12, %p288_p11 }
  0x26   :  { %p291_p0 = pnand %p290_p13, %p284_p10 }
  0x27   :  { %v153_v44 = vld [vmem:[#allocation2] sm:$0x1] }
  0x34   :  { %115 = vperm.xlu0 %238, %v113_v3  }
  0xa7   :  { %v125_v4 = vpop.xlane.xlu0 %124 }
  0xa8   :  { %v126_v5 = vsub.f32 %v112_v1, %v125_v4 }
  0xaa   :  { %v127_v6 = vmul.f32 1.442695, %v126_v5 }
  0xac   :  { %239 = vpow2.f32 %v127_v6 }
  0xaf   :  { %v116_v9 = vpop.permute.xlu0 %115 }
  0xb0   :  { %vm117_vm1 = vcmp.eq.s32.totalorder %v354_v8, %v116_v9 }
  0xb1   :  { %v118_v11 = vsel %vm117_vm1, %v112_v1, 0.0 }
  0xb2   :  { %v120_v13 = vsel %vm119_vm0, %v118_v11, 0.0 }
  0xb9   :  { %v240_v10 = vpop.eup %239 }
  0xba   :  { %v129_v12 = vsel %vm119_vm0, %v240_v10, 0.0 }
  0xbb   :  { %130 = vadd.xlane.f32.xlu1 %v129_v12 }
  0xbf   :  { %121 = vadd.xlane.f32.xlu1 %v120_v13 }
 0x144   :  { %v131_v14 = vpop.xlane.xlu1 %130 }
 0x145   :  { %241 = vlog2.f32 %v131_v14 }
 0x148   :  { %v122_v25 = vpop.xlane.xlu1 %121 }
 0x152   :  { %v242_v21 = vpop.eup %241 }
 0x153   :  { %v133_v22 = vmul.f32 0.6931472, %v242_v21 }
 0x155   :  { %v134_v26 = vadd.f32 %v133_v22, %v125_v4 }
 0x157   :  { %v139_v27 = vsub.f32 %v134_v26, %v122_v25 }
 0x159   :  { %v142_v30 = vsel %vm141_vm3, %v139_v27, 0.0 }
 0x15a   :  { %143 = vadd.xlane.f32.xlu1 %v142_v30 }
 0x15e   :  { %180 = vadd.xlane.f32.xlu1 %v179_v31 }
 0x1e3   :  { %v144_v33 = vpop.xlane.xlu1 %143 }
 0x1e4   :  { %v145_v34 = vrot.slane %v144_v33, 4 }
 0x1e6   :  { %v146_v35 = vadd.f32 %v145_v34, %v144_v33 }
 0x1e7   :  { %v181_v40 = vpop.xlane.xlu1 %180 }
 0x1e8   :  { %v147_v36 = vrot.slane %v146_v35, 2  ;;  %v182_v41 = vrot.slane %v181_v40, 4 }
 0x1ea   :  { %v148_v37 = vadd.f32 %v147_v36, %v146_v35  ;;  %v183_v42 = vadd.f32 %v182_v41, %v181_v40 }
 0x1ec   :  { %v149_v38 = vrot.slane %v148_v37, 1  ;;  %v184_v43 = vrot.slane %v183_v42, 2 }
 0x1ee   :  { %v150_v39 = vadd.f32 %v149_v38, %v148_v37  ;;  %v185_v47 = vadd.f32 %v184_v43, %v183_v42 }
 0x1f0   :  { %225 = vpush %v150_v39  ;;  %v186_v48 = vrot.slane %v185_v47, 1 }
 0x1f2   :  { %v187_v50 = vadd.f32 %v186_v48, %v185_v47 }
 0x221   :  { %s226_s0 = spop %225 }
 0x222   :  { %v154_v45 = vstv %s226_s0 }
 0x223   :  { %v155_v46 = vadd.f32 %v154_v45, %v153_v44 }
 0x225   :  { %157 = vst.msk [vmem:[#allocation2] sm:$0x1] %vm104_vm4, %v155_v46 }
 0x22c   :  { %v161_v49 = vld [vmem:[#allocation2] sm:$0x1] }
 0x22d   :  { %227 = vpush %v161_v49 }
 0x22e   :  { %229 = vpush %v187_v50 }
 0x25e   :  { %s228_s1 = spop %227 }
 0x25f   :  { %v166_v52 = vstv %s228_s1  ;;  %s230_s3 = spop %229 }
 0x260   :  { %v167_v53 = vsel %vm165_vm7, %v166_v52, 0.0  ;;  %s189_s6 = smul.f32 0.00390625, %s230_s3 }
 0x262   :  { %v194_v54 = vstv %s189_s6 }
 0x263   :  { %v195_v55 = vsel %vm193_vm9, %v194_v54, %v167_v53 }
 0x264   :  { %196 = vst [vmem:[#allocation8] sm:$0xff] %v195_v55 }
 0x265   :  { %294 = shalt.err (!%p291_p0)
}
 0x266   :  { %206 = dma.vmem_to_hbm [thread:$0]  %s204_s5, 128, %s370_s4, [#allocation5]  }
 0x267   :  { %307 = dma.done.wait [#allocation5], 128  }
 0x268   :  { %308 = vsyncadd [#allocation5], 4294967168 }
 0x269   :  { %210 = vsyncpa [#allocation4], 1 }
 0x26a   :  { %211 = vsyncpa [#allocation7], 1 }
 0x26b   :  { %212 = vsyncpa [#allocation5], 1 }

</bundles_post_ra>
